<compile_context>
chip_gen: v7x
topology: tpu7x:2x2x1
jax: 0.10.0
libtpu: 0.0.40
codegen_flags: <defaults>
</compile_context>

<pallas_src>
import jax
import jax.numpy as jnp
from jax.experimental import pallas as pl
from jax.experimental.pallas import tpu as pltpu


def transition_kernel(x_ref, w_ref, b_ref, o_ref):
    # x_ref: (TB, TH//2, 2, W//2, 2*Cin) bf16 -- H-pairs on dim 2, W-pairs
    #                                           packed into the lane axis
    # w_ref: (Cin, Cout) bf16  -- 1x1 conv weight with BN scale * 0.25 folded in
    # b_ref: (1, Cout)   f32   -- bias = BN_shift @ conv_weight
    # o_ref: (TB, TH//2, W//2, Cout) f32
    TB, TH2, _, W2, Cin2 = x_ref.shape
    Cin = Cin2 // 2
    Cout = w_ref.shape[1]

    # 2x2 sum-pool straight off the ref: four quarter-size slices summed in f32
    # (v5e has no bf16 VALU).  No full-tile temporaries are materialized.
    s = (x_ref[:, :, 0, :, :Cin].astype(jnp.float32)
         + x_ref[:, :, 0, :, Cin:].astype(jnp.float32)
         + x_ref[:, :, 1, :, :Cin].astype(jnp.float32)
         + x_ref[:, :, 1, :, Cin:].astype(jnp.float32))        # (TB,TH2,W2,Cin)

    # 1x1 conv == channel matmul on the MXU: bf16 operands, f32 accumulation.
    y = jnp.dot(s.reshape(TB * TH2 * W2, Cin).astype(jnp.bfloat16), w_ref[...],
                preferred_element_type=jnp.float32)
    y = y + b_ref[0, :]                                        # folded BN shift
    # Toy Cout < 128 means masked stores; real DenseNet transitions (Cout>=128)
    # are lane-dense here.
    o_ref[...] = y.reshape(TB, TH2, W2, Cout).astype(o_ref.dtype)


def _device_vmem_config():
    """(vmem_limit_bytes, block_budget_bytes, want_two_grid_steps)."""
    try:
        kind = jax.devices()[0].device_kind.lower()
    except Exception:
        kind = ""
    if "v5" in kind or "v6" in kind:
        # 128 MiB physical VMEM: raise the limit past the scoped default and
        # allow big blocks (measured ~85% of HBM roofline at large tiles).
        # Single TensorCore -> no need to keep multiple grid steps alive.
        return 64 * 1024 * 1024, 24 * 1024 * 1024, False
    # v7x (64 MiB physical VMEM, 2 TCs) or unknown: stay conservative and keep
    # at least two grid steps so both cores get work.
    return 40 * 1024 * 1024, 12 * 1024 * 1024, True


def _block_bytes(tb, th, W, Cin, Cout):
    """Honest per-step VMEM footprint: double-buffered blocks + temporaries."""
    th2, w2 = th // 2, W // 2
    x_blk = tb * th2 * 2 * w2 * 2 * Cin * 2          # bf16 input block
    o_blk = tb * th2 * w2 * Cout * 4                 # f32 output block
    w_blk = Cin * Cout * 2 + Cout * 4                # folded weight + bias
    tmp = tb * th2 * w2 * (Cin * 4 + Cin * 2 + Cout * 4)   # pool f32 + bf16 + acc
    return 2 * (x_blk + o_blk + w_blk) + tmp


def _pick_tiles(N, H, W, Cin, Cout, budget_bytes, want_two_steps):
    """Largest (TB, TH) whose working set fits the budget.  Grow TH first
    (even divisors of H), then fold batch elements once TH == H."""
    th_divs = [t for t in range(2, H + 1, 2) if H % t == 0]
    tb_divs = [t for t in range(1, N + 1) if N % t == 0]
    max_steps = N * (H // 2)
    best_tb, best_th, best_sz = 1, th_divs[0], -1
    for tb in tb_divs:
        for th in th_divs:
            if tb > 1 and th != H:
                continue                              # fold batch only once H is whole
            if want_two_steps and max_steps >= 2 and (N // tb) * (H // th) < 2:
                continue                              # leave work for the 2nd core
            if _block_bytes(tb, th, W, Cin, Cout) > budget_bytes:
                continue
            sz = tb * th
            if sz > best_sz:
                best_sz, best_tb, best_th = sz, tb, th
    return best_tb, best_th


def transition_forward_nhwc(x_nhwc, gamma, beta, running_mean, running_var,
                            conv_w, eps=1e-5, tiles=None):
    """Core NHWC implementation. x_nhwc: (N, H, W, Cin) -> (N, H/2, W/2, Cout)."""
    N, H, W, Cin = x_nhwc.shape
    Cout = conv_w.shape[0]
    # PyTorch AvgPool2d(2,2) would floor odd spatial dims; not handled here.
    assert H % 2 == 0 and W % 2 == 0

    # --- fold BN (inference) + 1/4 pool factor into the weight, in f32 ---
    scale = gamma / jnp.sqrt(running_var + eps)                  # (Cin,)
    shift = beta - running_mean * scale                          # (Cin,)
    w_f32 = conv_w.reshape(Cout, Cin).T.astype(jnp.float32)      # (Cin, Cout)
    w_folded = ((0.25 * scale)[:, None] * w_f32).astype(jnp.bfloat16)
    bias = (shift @ w_f32).reshape(1, Cout).astype(jnp.float32)  # (1, Cout)

    # bf16 input halves the dominant HBM read stream.  Free row-major regroup:
    # (N, H/2, 2, W/2, 2*Cin) -- H-pairs on a major dim, W-pairs in the lanes.
    x_packed = x_nhwc.astype(jnp.bfloat16).reshape(N, H // 2, 2, W // 2, 2 * Cin)

    vmem_limit, budget, want_two_steps = _device_vmem_config()
    if tiles is None:
        TB, TH = _pick_tiles(N, H, W, Cin, Cout, budget, want_two_steps)
    else:
        TB, TH = tiles
    assert N % TB == 0 and H % TH == 0 and TH % 2 == 0
    TH2, W2 = TH // 2, W // 2

    out_nhwc = pl.pallas_call(
        transition_kernel,
        out_shape=jax.ShapeDtypeStruct((N, H // 2, W // 2, Cout), jnp.float32),
        grid_spec=pltpu.PrefetchScalarGridSpec(
            num_scalar_prefetch=0,
            grid=(N // TB, H // TH),
            in_specs=[
                pl.BlockSpec((TB, TH2, 2, W2, 2 * Cin),
                             lambda b, h: (b, h, 0, 0, 0)),
                pl.BlockSpec((Cin, Cout), lambda b, h: (0, 0)),
                pl.BlockSpec((1, Cout), lambda b, h: (0, 0)),
            ],
            out_specs=pl.BlockSpec((TB, TH2, W2, Cout),
                                   lambda b, h: (b, h, 0, 0)),
        ),
        compiler_params=pltpu.CompilerParams(
            dimension_semantics=("parallel", "parallel"),
            vmem_limit_bytes=vmem_limit,
        ),
    )(x_packed, w_folded, bias)
    return out_nhwc


def transition_forward(x_nchw, gamma, beta, running_mean, running_var, conv_w,
                       eps=1e-5, tiles=None):
    """NCHW wrapper matching the PyTorch module interface."""
    # TODO(synk): these NCHW<->NHWC transposes are a full extra HBM round trip;
    # keep the network NHWC end-to-end and call transition_forward_nhwc.
    x_nhwc = jnp.transpose(x_nchw, (0, 2, 3, 1))
    out_nhwc = transition_forward_nhwc(x_nhwc, gamma, beta, running_mean,
                                       running_var, conv_w, eps, tiles)
    return jnp.transpose(out_nhwc, (0, 3, 1, 2))


def transition_reference(x_nchw, gamma, beta, running_mean, running_var,
                         conv_w, eps=1e-5):
    """Pure-JAX reference matching PyTorch (eval-mode BN), all f32."""
    m = running_mean[None, :, None, None]
    v = running_var[None, :, None, None]
    g = gamma[None, :, None, None]
    b = beta[None, :, None, None]
    xb = (x_nchw - m) / jnp.sqrt(v + eps) * g + b
    w2 = conv_w.reshape(conv_w.shape[0], conv_w.shape[1])        # (Cout, Cin)
    y = jnp.einsum('nchw,oc->nohw', xb, w2)
    N, Co, H, W = y.shape
    y = y.reshape(N, Co, H // 2, 2, W // 2, 2).mean(axis=(3, 5))
    return y


if __name__ == "__main__":
    key = jax.random.PRNGKey(0)
    k_x, k_w, k_g, k_b, k_m, k_v = jax.random.split(key, 6)

    N, Cin, H, W = 2, 32, 16, 16
    Cout = 16

    x = jax.random.normal(k_x, (N, Cin, H, W), dtype=jnp.float32)
    conv_w = jax.random.normal(k_w, (Cout, Cin, 1, 1), dtype=jnp.float32) * 0.1
    gamma = 1.0 + 0.1 * jax.random.normal(k_g, (Cin,), dtype=jnp.float32)
    beta = 0.1 * jax.random.normal(k_b, (Cin,), dtype=jnp.float32)
    running_mean = 0.1 * jax.random.normal(k_m, (Cin,), dtype=jnp.float32)
    running_var = jnp.abs(1.0 + 0.1 * jax.random.normal(k_v, (Cin,),
                                                        dtype=jnp.float32))

    out = transition_forward(x, gamma, beta, running_mean, running_var, conv_w)
    out = jax.block_until_ready(out)

    ref = transition_reference(x, gamma, beta, running_mean, running_var,
                               conv_w)
    assert out.shape == (N, Cout, H // 2, W // 2), out.shape
    # Tolerance accounts for bf16 input / bf16 MXU operands (f32 accumulation).
    assert jnp.allclose(out, ref, atol=5e-2, rtol=5e-2), float(
        jnp.max(jnp.abs(out - ref)))

    print("KERNEL_OK")
</pallas_src>

<mosaic_0001>
module attributes {stable_mosaic.version = 11 : i64} {
  func.func @transition_kernel(%arg0: i32, %arg1: i32, %arg2: memref<1x8x2x8x64xbf16, #tpu.memory_space<vmem>>, %arg3: memref<32x16xbf16, #tpu.memory_space<vmem>>, %arg4: memref<1x16xf32, #tpu.memory_space<vmem>>, %arg5: memref<1x8x8x16xf32, #tpu.memory_space<vmem>>) attributes {dimension_semantics = [#tpu.dimension_semantics<parallel>, #tpu.dimension_semantics<parallel>], iteration_bounds = array<i64: 2, 1>, scalar_prefetch = 0 : i64, scratch_operands = 0 : i64, tpu.core_type = #tpu.core_type<tc>, window_params = [{transform_indices = @transform_0, window_bounds = array<i64: 1, 8, 2, 8, 64>}, {pipeline_mode = #tpu.pipeline_mode<synchronous>, transform_indices = @transform_1, window_bounds = array<i64: 32, 16>}, {pipeline_mode = #tpu.pipeline_mode<synchronous>, transform_indices = @transform_2, window_bounds = array<i64: 1, 16>}, {transform_indices = @transform_3, window_bounds = array<i64: 1, 8, 8, 16>}]} {
    %c0 = arith.constant 0 : index
    %c0_0 = arith.constant 0 : index
    %c0_1 = arith.constant 0 : index
    %c0_2 = arith.constant 0 : index
    %c0_3 = arith.constant 0 : index
    %0 = vector.load %arg2[%c0, %c0_0, %c0_1, %c0_2, %c0_3] : memref<1x8x2x8x64xbf16, #tpu.memory_space<vmem>>, vector<1x8x1x8x32xbf16>
    %1 = vector.shape_cast %0 : vector<1x8x1x8x32xbf16> to vector<1x8x8x32xbf16>
    %2 = arith.extf %1 : vector<1x8x8x32xbf16> to vector<1x8x8x32xf32>
    %c0_4 = arith.constant 0 : index
    %c0_5 = arith.constant 0 : index
    %c0_6 = arith.constant 0 : index
    %c0_7 = arith.constant 0 : index
    %c32 = arith.constant 32 : index
    %3 = vector.load %arg2[%c0_4, %c0_5, %c0_6, %c0_7, %c32] : memref<1x8x2x8x64xbf16, #tpu.memory_space<vmem>>, vector<1x8x1x8x32xbf16>
    %4 = vector.shape_cast %3 : vector<1x8x1x8x32xbf16> to vector<1x8x8x32xbf16>
    %5 = arith.extf %4 : vector<1x8x8x32xbf16> to vector<1x8x8x32xf32>
    %6 = arith.addf %2, %5 : vector<1x8x8x32xf32>
    %c0_8 = arith.constant 0 : index
    %c0_9 = arith.constant 0 : index
    %c1 = arith.constant 1 : index
    %c0_10 = arith.constant 0 : index
    %c0_11 = arith.constant 0 : index
    %7 = vector.load %arg2[%c0_8, %c0_9, %c1, %c0_10, %c0_11] : memref<1x8x2x8x64xbf16, #tpu.memory_space<vmem>>, vector<1x8x1x8x32xbf16>
    %8 = vector.shape_cast %7 : vector<1x8x1x8x32xbf16> to vector<1x8x8x32xbf16>
    %9 = arith.extf %8 : vector<1x8x8x32xbf16> to vector<1x8x8x32xf32>
    %10 = arith.addf %6, %9 : vector<1x8x8x32xf32>
    %c0_12 = arith.constant 0 : index
    %c0_13 = arith.constant 0 : index
    %c1_14 = arith.constant 1 : index
    %c0_15 = arith.constant 0 : index
    %c32_16 = arith.constant 32 : index
    %11 = vector.load %arg2[%c0_12, %c0_13, %c1_14, %c0_15, %c32_16] : memref<1x8x2x8x64xbf16, #tpu.memory_space<vmem>>, vector<1x8x1x8x32xbf16>
    %12 = vector.shape_cast %11 : vector<1x8x1x8x32xbf16> to vector<1x8x8x32xbf16>
    %13 = arith.extf %12 : vector<1x8x8x32xbf16> to vector<1x8x8x32xf32>
    %14 = arith.addf %10, %13 : vector<1x8x8x32xf32>
    %15 = vector.shape_cast %14 : vector<1x8x8x32xf32> to vector<64x32xf32>
    %16 = arith.truncf %15 : vector<64x32xf32> to vector<64x32xbf16>
    %c0_17 = arith.constant 0 : index
    %c0_18 = arith.constant 0 : index
    %17 = vector.load %arg3[%c0_17, %c0_18] : memref<32x16xbf16, #tpu.memory_space<vmem>>, vector<32x16xbf16>
    %cst = arith.constant dense<0.000000e+00> : vector<64x16xf32>
    %18 = tpu.matmul %16, %17, %cst {dimension_numbers = #tpu.dot_dimension_numbers<[1], [0], [0], [1], [0, 0, 1, 1], [], []>} : vector<64x32xbf16>, vector<32x16xbf16>, vector<64x16xf32> -> vector<64x16xf32>
    %c0_19 = arith.constant 0 : index
    %c0_20 = arith.constant 0 : index
    %19 = vector.load %arg4[%c0_19, %c0_20] : memref<1x16xf32, #tpu.memory_space<vmem>>, vector<1x16xf32>
    %20 = vector.shape_cast %19 : vector<1x16xf32> to vector<16xf32>
    %21 = vector.shape_cast %20 : vector<16xf32> to vector<1x16xf32>
    %22 = vector.broadcast %21 : vector<1x16xf32> to vector<64x16xf32>
    %23 = arith.addf %18, %22 : vector<64x16xf32>
    %24 = vector.shape_cast %23 : vector<64x16xf32> to vector<1x8x8x16xf32>
    %c0_21 = arith.constant 0 : index
    %c0_22 = arith.constant 0 : index
    %c0_23 = arith.constant 0 : index
    %c0_24 = arith.constant 0 : index
    %25 = vector.load %arg5[%c0_21, %c0_22, %c0_23, %c0_24] : memref<1x8x8x16xf32, #tpu.memory_space<vmem>>, vector<1x8x8x16xf32>
    tpu.vector_store %arg5[%c0_21, %c0_22, %c0_23, %c0_24], %24 {strides = array<i32>} : memref<1x8x8x16xf32, #tpu.memory_space<vmem>>, vector<1x8x8x16xf32>,
    return
  }
  func.func @transform_0(%arg0: i32, %arg1: i32) -> (i32, i32, i32, i32, i32) {
    %c0_i32 = arith.constant 0 : i32
    %c0_i32_0 = arith.constant 0 : i32
    %c0_i32_1 = arith.constant 0 : i32
    %c0_i32_2 = arith.constant 0 : i32
    return %arg0, %arg1, %c0_i32, %c0_i32_0, %c0_i32_1 : i32, i32, i32, i32, i32
  }
  func.func @transform_1(%arg0: i32, %arg1: i32) -> (i32, i32) {
    %c0_i32 = arith.constant 0 : i32
    %c0_i32_0 = arith.constant 0 : i32
    %c0_i32_1 = arith.constant 0 : i32
    return %c0_i32, %c0_i32_0 : i32, i32
  }
  func.func @transform_2(%arg0: i32, %arg1: i32) -> (i32, i32) {
    %c0_i32 = arith.constant 0 : i32
    %c0_i32_0 = arith.constant 0 : i32
    %c0_i32_1 = arith.constant 0 : i32
    return %c0_i32, %c0_i32_0 : i32, i32
  }
  func.func @transform_3(%arg0: i32, %arg1: i32) -> (i32, i32, i32, i32) {
    %c0_i32 = arith.constant 0 : i32
    %c0_i32_0 = arith.constant 0 : i32
    %c0_i32_1 = arith.constant 0 : i32
    return %arg0, %arg1, %c0_i32, %c0_i32_0 : i32, i32, i32, i32
  }
}

</mosaic_0001>

<bundles_post_ra>
// kernel: tpu_custom_call.1
= control target key start
LH: loop header
LB: loop body
LE: loop exit
PB: predicated region body
PF: predicated region fallthrough
CT: control target
= control target key end

     0   :  { %8 = vsyncpa [#allocation3], 0  ;;  %s1093_s0 = inlined_call_operand.hbm [shape: bf16[2,8,2,8,64], index: 0, kind: input, shape index: {}]   ;;  %s1094_s1 = inlined_call_operand.vmem [shape: bf16[32,16], index: 1, kind: input, shape index: {}]   ;;  %s1095_s2 = inlined_call_operand.vmem [shape: f32[1,16], index: 2, kind: input, shape index: {}]   ;;  %s1096_s3 = inlined_call_operand.hbm [shape: f32[2,8,8,16], index: 3, kind: output, shape index: {}]  }
   0x1   :  { %10 = vsyncpa [#allocation3 + $0x1], 0 }
   0x2   :  { %11 = vsyncpa [#allocation4], 0 }
   0x3   :  { %13 = vsyncpa [#allocation4 + $0x1], 0  ;;  %s869_s12 = smov 0   ;;  %s871_s13 = smov 0  }
   0x4   :  { %s873_s14 = smov 0   ;;  %s875_s15 = smov 0  }
   0x5   :  { %s877_s16 = smov 0   ;;  %s879_s17 = smov 0  }
   0x6 LB: > { %s549_s18 = sadd.s32 4294967295, %s840_s17   ;;  %s550_s19 = sadd.s32 4294967294, %s840_s17   ;;  %s840_s17 = sphi %s879_s17, %s19_s17   ;;  %s836_s16 = sphi %s877_s16, %s1111_s16   ;;  %s832_s15 = sphi %s875_s15, %s1110_s15   ;;  %s828_s14 = sphi %s873_s14, %s1109_s14   ;;  %s824_s13 = sphi %s871_s13, %s1108_s13   ;;  %s820_s12 = sphi %s869_s12, %s1107_s12  }
   0x7   : > { %s31_s20 = sadd.s32 1, %s836_s16  ;;  %s40_s21 = sadd.s32 1, %s828_s14 }
   0x8   : > { %p33_p0 = scmp.ge.s32.totalorder %s31_s20, 2  ;;  %p47_p1 = scmp.ne.s32.totalorder %s828_s14, %s824_s13 }
   0x9   : > { %p48_p2 = scmp.eq.s32.totalorder %s840_s17, 0  ;;  %p53_p3 = scmp.ne.s32.totalorder %s824_s13, %s820_s12 }
   0xa   : > { %s1113_s20 = smov (%p33_p0, %s31_s20), 0  ;;  %p54_p5 = scmp.eq.s32.totalorder %s549_s18, 0 }
   0xb   : > { %p910_p4 = por %p48_p2, %p47_p1  ;;  %s35_s23 = ssub.s32 %s836_s16, %s1113_s20 }
   0xc   : > { %p121_p6 = scmp.eq.s32.totalorder %s549_s18, 1  ;;  %p38_p7 = scmp.eq.s32.totalorder %s35_s23, 0 }
   0xd   : > { %p916_p8 = por %p54_p5, %p53_p3  ;;  %p127_p10 = scmp.eq.s32.totalorder %s550_s19, 1 }
   0xe   : > { %p920_p9 = por %p121_p6, %p47_p1  ;;  %p615_p13 = scmp.lt.s32.totalorder %s840_s17, 2 }
   0xf   : > { %s925_s26 = scalar_select %p38_p7, %s828_s14, %s40_s21  }
  0x10   : > { %s1100_s25 = scalar_select %p920_p9, 1, 0 }
  0x11   : > { %p927_p11 = por %p127_p10, %p53_p3  ;;  %s153_s28 = sand.u32 1, %s828_s14  }
  0x12   : > { %s553_s29 = sshll.u32 %s153_s28, 6  ;;  %s579_s30 = sshll.u32 %s836_s16, 10 }
  0x13   : > { %s1101_s27 = scalar_select %p927_p11, 1, 0 }
  0x14   : > { %s938_s6 = scalar_lea.hbm %s1093_s0, %s579_s30  ;;  %s157_s7 = scalar_lea.vmem [#allocation2], %s553_s29 }
  0x15   : > { %s167_s8 = sshll.u32 %s157_s7, 4  ;;  %p944_p0 = pnand %p615_p13, %p910_p4  ;;  %s940_s8 = int_to_ptr.vmem [resolvable:$true] %s167_s8 }
  0x16   : > { %s949_s10 = scalar_lea.sflag [#allocation3], %s153_s28  ;;  %s728_s11 = scalar_lea.hbm %s938_s6, 1024 }
  0x17   : > { %p729_p2 = scmp.ne.s32.totalorder %s938_s6, %s728_s11  ;;  %p730_p3 = pneg %p944_p0 }
  0x18   : > { %s733_s21 = scalar_lea.hbm %s1093_s0, 2048  ;;  %p734_p4 = scmp.lt.u32.totalorder %s938_s6, %s1093_s0 }
  0x19   : > { %p731_p5 = pnand %p730_p3, %p729_p2  ;;  %p735_p7 = scmp.lt.u32.totalorder %s733_s21, %s728_s11 }
  0x1a   : > { %p737_p13 = scmp.lt.u32.totalorder %s728_s11, %s938_s6 }
  0x1b   : > { %p732_p6 = pneg %p731_p5  ;;  %p736_p10 = por %p735_p7, %p734_p4 }
  0x1d   : > { %p738_p12 = por %p737_p13, %p736_p10 }
  0x1f   : > { %p739_p1 = pnand %p738_p12, %p732_p6 }
  0x21   : > { %742 = shalt.err (!%p739_p1)
}
  0x22   : > { %s743_s28 = scalar_lea.vmem %s940_s8, 1024  ;;  %s842_s29 = smov [#allocation2]  }
  0x23   : > { %p744_p2 = scmp.ne.s32.totalorder %s940_s8, %s743_s28  ;;  %s748_s30 = sshll.u32 %s842_s29, 4  ;;  %s749_s30 = int_to_ptr.vmem [resolvable:$false] %s748_s30 }
  0x24   : > { %s750_s4 = scalar_lea.vmem %s749_s30, 2048  ;;  %p751_p9 = scmp.lt.s32.totalorder %s940_s8, %s749_s30 }
  0x25   : > { %p746_p5 = pnand %p744_p2, %p730_p3  ;;  %p752_p4 = scmp.lt.s32.totalorder %s750_s4, %s743_s28 }
  0x27   : > { %p747_p11 = pneg %p746_p5  ;;  %p753_p7 = por %p752_p4, %p751_p9 }
  0x29   : > { %p754_p10 = pnand %p753_p7, %p747_p11 }
  0x2b   : > { %757 = shalt.err (!%p754_p10)
}
  0x2c   : > { %s843_s5 = smov 64   ;;  %s844_s7 = smov 4  }
  0x2d   : > { %610 = dma.hbm_to_vmem [thread:$0]  (!%p944_p0), %s938_s6, 1024, %s940_s8, %s949_s10, %s843_s5, %s843_s5, %s844_s7  }
  0x2e   : > { %p175_p12 = scmp.lt.s32.totalorder %s840_s17, 3  ;;  %p1103_p1 = scmp.ge.s32.totalorder %s840_s17, 1 }
  0x30   : > { %p176_p3 = pnand %p1103_p1, %p175_p12 }
  0x31   : > { %s981_s11 = sand.u32 (!%p176_p3), 1, %s824_s13  }
  0x32   : > { %179 = sbr.rel (%p176_p3) target bundleno = 427 (0x1ab), region = 32  ;;  %s557_s18 = sshll.u32 (!%p176_p3), %s981_s11, 6 }
  0x33   : > { %s182_s19 = scalar_lea.sflag (!%p176_p3), [#allocation3], %s981_s11  ;;  %s185_s21 = scalar_lea.vmem (!%p176_p3), [#allocation2], %s557_s18 }
  0x39   : > { %811 = dma.done.wait (%p916_p8), %s182_s19, 1024  }
  0x3a   : > { %813 = vsyncadd (%p916_p8), %s182_s19, 4294966272  ;;  %v991_v0 = vld [vmem:[%s185_s21 + $0x10] sm:$0xff]   ;;  %v993_v1 = vld [vmem:[%s185_s21 + $0x18] sm:$0xff]   ;;  %s845_s8 = smov 96   ;;  %vm359_vm0 = vcmask 261120   ;;  %vm437_vm1 = vcmask 130048  }
  0x3b   : > { %v211_v2 = vld [vmem:[%s185_s21] sm:$0xff]   ;;  %v221_v3 = vunpack.c.l.bf16 %v991_v0  ;;  %v222_v4 = vunpack.c.l.bf16 %v993_v1  ;;  %v212_v5 = vld [vmem:[%s185_s21 + $0x8] sm:$0xff]   ;;  %v997_v7 = vld [vmem:[%s185_s21 + $0x30] sm:$0xff]   ;;  %v278_v30 = vunpack.c.h.bf16 %v991_v0  ;;  %v279_v31 = vunpack.c.h.bf16 %v993_v1  ;;  %s580_s28 = sshll.u32 %s832_s15, 10  ;;  %s207_s29 = scalar_lea.vmem [#allocation5], %s557_s18 }
  0x3c   : > { %v219_v6 = vunpack.c.l.bf16 %v211_v2  ;;  %v999_v8 = vld [vmem:[%s185_s21 + $0x38] sm:$0xff]   ;;  %v220_v9 = vunpack.c.l.bf16 %v212_v5  ;;  %v225_v10 = vunpack.c.l.bf16 %v997_v7  ;;  %v215_v12 = vld [vmem:[%s185_s21 + $0x20] sm:$0xff]   ;;  %v216_v13 = vld [vmem:[%s185_s21 + $0x28] sm:$0xff]   ;;  %v276_v24 = vunpack.c.h.bf16 %v211_v2  ;;  %s462_s30 = sshll.u32 %s207_s29, 4  ;;  %s1037_s5 = scalar_lea.hbm %s1096_s3, %s580_s28  ;;  %s1039_s30 = int_to_ptr.vmem [resolvable:$true] %s462_s30 }
  0x3d   : > { %v226_v11 = vunpack.c.l.bf16 %v999_v8  ;;  %v680_v14 = vpack.i.bf16 %v222_v4, %v221_v3  ;;  %v223_v15 = vunpack.c.l.bf16 %v215_v12  ;;  %v224_v16 = vunpack.c.l.bf16 %v216_v13  ;;  %v710_v17 = vld [vmem:[%s1094_s1] sm:$0xff]   ;;  %v711_v22 = vld [vmem:[%s1094_s1 + $0x8] sm:$0xff]   ;;  %s447_s7 = scalar_lea.sflag [#allocation4], %s981_s11  ;;  %s758_s18 = scalar_lea.vmem %s1039_s30, 1024 }
  0x3e   : > { %v670_v18 = vpack.i.bf16 %v220_v9, %v219_v6  ;;  %v280_v20 = vunpack.c.h.bf16 %v215_v12  ;;  %v281_v21 = vunpack.c.h.bf16 %v216_v13  ;;  %587 = vmatprep.subr.bf16.mxu0 %v710_v17  ;;  %v277_v25 = vunpack.c.h.bf16 %v212_v5  ;;  %599 = vmatprep.subr.bf16.mxu1 %v710_v17  ;;  %p759_p8 = scmp.ne.s32.totalorder %s1039_s30, %s758_s18  ;;  %p1104_p9 = scmp.ne.s32.totalorder %s1100_s25, 0 }
  0x3f   : > { %681 = vrot.lane.b32.xlu1 %v680_v14, %s845_s8  ;;  %v685_v19 = vpack.i.bf16 %v226_v11, %v225_v10  ;;  %v675_v23 = vpack.i.bf16 %v224_v16, %v223_v15  ;;  %588 = vmatpush3.bf16.msra.mxu0 %v710_v17  ;;  %v282_v27 = vunpack.c.h.bf16 %v997_v7  ;;  %v283_v28 = vunpack.c.h.bf16 %v999_v8  ;;  %s846_s19 = smov [#allocation5]  }
  0x40   : > { %671 = vrot.lane.b32.xlu0 %v670_v18, %s845_s8  ;;  %601 = vmatpush3.bf16.msra.mxu1 %v710_v17  ;;  %v695_v26 = vpack.i.bf16 %v281_v21, %v280_v20  ;;  %v690_v29 = vpack.i.bf16 %v277_v25, %v276_v24  ;;  %v700_v33 = vpack.i.bf16 %v279_v31, %v278_v30  ;;  %p760_p11 = pnand %p759_p8, %p1104_p9  ;;  %s762_s21 = sshll.u32 %s846_s19, 4  ;;  %s763_s21 = int_to_ptr.vmem [resolvable:$false] %s762_s21 }
  0x41   : > { %589 = vmatprep.subr.bf16.mxu0 %v711_v22  ;;  %600 = vmatprep.subr.bf16.mxu1 %v711_v22  ;;  %v705_v32 = vpack.i.bf16 %v283_v28, %v282_v27  ;;  %s764_s24 = scalar_lea.vmem %s763_s21, 2048  ;;  %p765_p6 = scmp.lt.s32.totalorder %s1039_s30, %s763_s21 }
  0x42   : > { %p761_p0 = pneg %p760_p11  ;;  %p766_p13 = scmp.lt.s32.totalorder %s764_s24, %s758_s18 }
  0x43   : > { %686 = vrot.lane.b32.xlu1 %v685_v19, %s845_s8  ;;  %590 = vmatpush3.bf16.msra.mxu0 %v711_v22 }
  0x44   : > { %676 = vrot.lane.b32.xlu0 %v675_v23, %s845_s8  ;;  %602 = vmatpush3.bf16.msra.mxu1 %v711_v22  ;;  %p767_p2 = por %p766_p13, %p765_p6 }
  0x46   : > { %p768_p5 = pnand %p767_p2, %p761_p0 }
  0x47   : > { %696 = vrot.lane.b32.xlu1 %v695_v26, %s845_s8 }
  0x48   : > { %691 = vrot.lane.b32.xlu0 %v690_v29, %s845_s8 }
  0x4b   : > { %706 = vrot.lane.b32.xlu1 %v705_v32, %s845_s8 }
  0x4c   : > { %701 = vrot.lane.b32.xlu0 %v700_v33, %s845_s8 }
  0xb1   : > { %v682_v34 = vpop.permute.xlu1 %681 }
  0xb2   : > { %v672_v35 = vpop.permute.xlu0 %671  ;;  %v714_v40 = vadd.high.f32.bf16 %v222_v4, %v682_v34  ;;  %v715_v41 = vadd.low.f32.bf16 %v221_v3, %v682_v34 }
  0xb3   : > { %v712_v36 = vadd.high.f32.bf16 %v220_v9, %v672_v35  ;;  %v713_v37 = vadd.low.f32.bf16 %v219_v6, %v672_v35  ;;  %v567_v6 = vld [vmem:[%s1095_s2] ss:$0 sm:$0xff] }
  0xb4   : > { %v286_v52 = vadd.f32 %v715_v41, %v278_v30  ;;  %v287_v53 = vadd.f32 %v714_v40, %v279_v31 }
  0xb5   : > { %v687_v38 = vpop.permute.xlu1 %686  ;;  %v284_v45 = vadd.f32 %v713_v37, %v276_v24  ;;  %v285_v46 = vadd.f32 %v712_v36, %v277_v25 }
  0xb6   : > { %v677_v39 = vpop.permute.xlu0 %676  ;;  %v718_v47 = vadd.high.f32.bf16 %v226_v11, %v687_v38  ;;  %v719_v48 = vadd.low.f32.bf16 %v225_v10, %v687_v38 }
  0xb7   : > { %v716_v42 = vadd.high.f32.bf16 %v224_v16, %v677_v39  ;;  %v717_v43 = vadd.low.f32.bf16 %v223_v15, %v677_v39 }
  0xb8   : > { %v290_v59 = vadd.f32 %v719_v48, %v282_v27  ;;  %v291_v60 = vadd.f32 %v718_v47, %v283_v28 }
  0xb9   : > { %v697_v44 = vpop.permute.xlu1 %696  ;;  %v288_v50 = vadd.f32 %v717_v43, %v280_v20  ;;  %v289_v51 = vadd.f32 %v716_v42, %v281_v21 }
  0xba   : > { %v692_v49 = vpop.permute.xlu0 %691 }
  0xbb   : > { %v720_v55 = vadd.low.f32.bf16 %v284_v45, %v692_v49  ;;  %v721_v56 = vadd.high.f32.bf16 %v285_v46, %v692_v49  ;;  %v722_v57 = vadd.low.f32.bf16 %v288_v50, %v697_v44  ;;  %v723_v58 = vadd.high.f32.bf16 %v289_v51, %v697_v44 }
  0xbd   : > { %v707_v54 = vpop.permute.xlu1 %706  ;;  %v332_v62 = vpack.c.bf16 %v721_v56, %v720_v55  ;;  %v334_v63 = vpack.c.bf16 %v723_v58, %v722_v57 }
  0xbe   : > { %v702_v61 = vpop.permute.xlu0 %701  ;;  %v724_v0 = vadd.low.f32.bf16 %v290_v59, %v707_v54  ;;  %v725_v1 = vadd.high.f32.bf16 %v291_v60, %v707_v54 }
  0xbf   : > { %v726_v2 = vadd.high.f32.bf16 %v287_v53, %v702_v61  ;;  %v727_v3 = vadd.low.f32.bf16 %v286_v52, %v702_v61  ;;  %591 = vmatprep.mubr.msk.bf16.mxu0 %vm359_vm0, %v332_v62  ;;  %595 = vmatprep.mubr.msk.bf16.mxu1 %vm359_vm0, %v334_v63 }
  0xc0   : > { %v335_v4 = vpack.c.bf16 %v725_v1, %v724_v0 }
  0xc1   : > { %v333_v5 = vpack.c.bf16 %v726_v2, %v727_v3 }
  0xc2   : > { %596 = vmatmul.mubr.msk.bf16.vlgmr.msra.gmra.mrb[0].mxu1 %vm359_vm0, %v335_v4 }
  0xc3   : > { %592 = vmatmul.mubr.msk.bf16.vlgmr.msra.gmra.mrb[0].mxu0 %vm359_vm0, %v333_v5 }
 0x195   : > { %v597_v7 = vpop.f32.mrb[0].mxu1 }
 0x196   : > { %v593_v8 = vpop.f32.mrb[0].mxu0  ;;  %v431_v9 = vadd.f32 %v597_v7, %v567_v6  ;;  %v422_v10 = vpop.f32.mrb[1].mxu1 }
 0x197   : > { %v415_v11 = vadd.f32 %v593_v8, %v567_v6  ;;  %v406_v12 = vpop.f32.mrb[1].mxu0  ;;  %v423_v13 = vadd.f32 %v567_v6, %v422_v10  ;;  %v598_v14 = vpop.f32.mrb[2].mxu1 }
 0x198   : > { %444 = vst.msk [vmem:[%s207_s29 + $0x30] sm:$0xff] %vm437_vm1, %v431_v9  ;;  %v407_v15 = vadd.f32 %v567_v6, %v406_v12  ;;  %v594_v16 = vpop.f32.mrb[2].mxu0  ;;  %v434_v17 = vadd.f32 %v598_v14, %v567_v6  ;;  %v425_v18 = vpop.f32.mrb[3].mxu1 }
 0x199   : > { %440 = vst.msk [vmem:[%s207_s29 + $0x10] sm:$0xff] %vm437_vm1, %v415_v11  ;;  %442 = vst.msk [vmem:[%s207_s29 + $0x20] sm:$0xff] %vm437_vm1, %v423_v13  ;;  %v418_v19 = vadd.f32 %v594_v16, %v567_v6  ;;  %v409_v20 = vpop.f32.mrb[3].mxu0  ;;  %v426_v21 = vadd.f32 %v567_v6, %v425_v18 }
 0x19a   : > { %438 = vst.msk [vmem:[%s207_s29] sm:$0xff] %vm437_vm1, %v407_v15  ;;  %445 = vst.msk [vmem:[%s207_s29 + $0x38] sm:$0xff] %vm437_vm1, %v434_v17  ;;  %v410_v22 = vadd.f32 %v567_v6, %v409_v20 }
 0x19b   : > { %441 = vst.msk [vmem:[%s207_s29 + $0x18] sm:$0xff] %vm437_vm1, %v418_v19  ;;  %443 = vst.msk [vmem:[%s207_s29 + $0x28] sm:$0xff] %vm437_vm1, %v426_v21 }
 0x19c   : > { %439 = vst.msk [vmem:[%s207_s29 + $0x8] sm:$0xff] %vm437_vm1, %v410_v22 }
 0x19d   : > { %771 = shalt.err (!%p768_p5)
}
 0x19e   : > { %s772_s6 = scalar_lea.hbm %s1037_s5, 1024  ;;  %s776_s10 = scalar_lea.hbm %s1096_s3, 2048 }
 0x19f   : > { %p773_p4 = scmp.ne.s32.totalorder %s1037_s5, %s772_s6  ;;  %p777_p12 = scmp.lt.u32.totalorder %s1037_s5, %s1096_s3 }
 0x1a0   : > { %p778_p1 = scmp.lt.u32.totalorder %s776_s10, %s772_s6  ;;  %p780_p8 = scmp.lt.u32.totalorder %s772_s6, %s1037_s5 }
 0x1a1   : > { %p774_p7 = pnand %p773_p4, %p1104_p9 }
 0x1a2   : > { %p779_p3 = por %p778_p1, %p777_p12 }
 0x1a3   : > { %p775_p10 = pneg %p774_p7 }
 0x1a4   : > { %p781_p11 = por %p780_p8, %p779_p3 }
 0x1a6   : > { %p782_p0 = pnand %p781_p11, %p775_p10 }
 0x1a8   : > { %785 = shalt.err (!%p782_p0)
}
 0x1a9   : > { %s847_s28 = smov 128   ;;  %s848_s29 = smov 8  }
 0x1aa   : > { %605 = dma.vmem_to_hbm [thread:$0]  (%p1104_p9), %s1039_s30, 1024, %s1037_s5, %s447_s7, %s847_s28, %s847_s28, %s848_s29  }
 0x1ab PF: > { %s477_s15 = sand.u32 1, %s820_s12   ;;  %p1105_p6 = scmp.ne.s32.totalorder %s1101_s27, 0 }
 0x1ac   : > { %p1106_p13 = scmp.ge.s32.totalorder %s840_s17, 2  ;;  %s478_s4 = scalar_lea.sflag [#allocation4], %s477_s15 }
 0x1ae   : > { %p612_p2 = pnand %p1106_p13, %p1105_p6 }
 0x1b0   : > { %815 = dma.done.wait (!%p612_p2), %s478_s4, 1024  }
 0x1b1   : > { %817 = vsyncadd (!%p612_p2), %s478_s4, 4294966272  ;;  %s19_s17 = sadd.s32 1, %s840_s17   ;;  %s1107_s12 = smov %s824_s13 }
 0x1b2   : > { %p16_p5 = scmp.ge.s32.totalorder %s19_s17, 4   ;;  %s1108_s13 = smov %s828_s14 }
 0x1b3   : > { %s1109_s14 = smov %s925_s26  ;;  %s1110_s15 = smov %s836_s16 }
 0x1b4   : > { %s1111_s16 = smov %s1113_s20  ;;  %18 = sbr.rel (!%p16_p5) target bundleno = 6 (0x6), region = 78 }
 0x1bb   :  { %483 = vsyncpa [#allocation3], 1 }
 0x1bc   :  { %485 = vsyncpa [#allocation3 + $0x1], 1 }
 0x1bd   :  { %486 = vsyncpa [#allocation4], 1 }
 0x1be   :  { %488 = vsyncpa [#allocation4 + $0x1], 1 }

</bundles_post_ra>
